<compile_context>
chip_gen: v7x
topology: tpu7x:2x2x1
jax: 0.10.0
libtpu: 0.0.40
codegen_flags: <defaults>
</compile_context>

<pallas_src>
import jax
import jax.numpy as jnp
from jax.experimental import pallas as pl
from jax.experimental.pallas import tpu as pltpu


def world_model_kernel(o_ref, a_ref, w1_ref, b1_ref, w2_ref, b2_ref, out_ref):
    obs_dim = o_ref.shape[-1]
    # Layer 1: hidden = ReLU([o, a] @ W1 + b1), computed without materializing
    # the concat: W1 ref is statically sliced (free view, 8-aligned rows).
    h = jnp.dot(o_ref[...], w1_ref[:obs_dim, :],
                preferred_element_type=jnp.float32)
    h = h + jnp.dot(a_ref[...], w1_ref[obs_dim:, :],
                    preferred_element_type=jnp.float32)
    h = jnp.maximum(h + b1_ref[...].astype(jnp.float32), 0.0)
    # Layer 2: o_next = hidden @ W2 + b2   (f32 accumulation on the MXU)
    y = jnp.dot(h.astype(w2_ref.dtype), w2_ref[...],
                preferred_element_type=jnp.float32)
    out_ref[...] = (y + b2_ref[...].astype(jnp.float32)).astype(out_ref.dtype)


def _choose_block_b(B, obs_dim, act_dim, hidden_dim, itemsize,
                    vmem_budget_bytes=16 << 20):
    """Largest 8-aligned batch tile that divides B and fits the VMEM budget."""
    if B <= 8 or B % 8 != 0:
        return B                      # tiny / odd batches: one full block
    in_dim = obs_dim + act_dim
    # Per-row VMEM: double-buffered inputs (o + actions) + double-buffered
    # output tile + f32 intermediates.  Weights are grid-invariant and tiny.
    row_bytes = (2 * in_dim * itemsize + 2 * obs_dim * itemsize
                 + hidden_dim * 4 + obs_dim * 4)
    cap = max(8, (vmem_budget_bytes // row_bytes) // 8 * 8)
    bb = min(B, cap, 4096)
    bb -= bb % 8
    if bb >= B and B >= 1024:
        # large batches: keep >= 2 grid steps (pipelining + v7x megacore)
        bb = max(8, (B // 2) - ((B // 2) % 8))
    while bb > 8 and B % bb != 0:
        bb -= 8
    return bb


def world_model_forward(o, actions, params, *, block_b=None, compute_dtype=None):
    B, obs_dim = o.shape
    act_dim = actions.shape[-1]
    in_dim = obs_dim + act_dim
    hidden_dim = params["w1"].shape[1]
    assert params["w1"].shape == (in_dim, hidden_dim)
    assert obs_dim % 8 == 0, "obs_dim must be 8-aligned for the in-kernel W1 slice"

    w1, b1, w2, b2 = params["w1"], params["b1"], params["w2"], params["b2"]
    if compute_dtype is not None:
        o = o.astype(compute_dtype)
        actions = actions.astype(compute_dtype)
        w1 = w1.astype(compute_dtype)
        w2 = w2.astype(compute_dtype)

    itemsize = jnp.dtype(o.dtype).itemsize
    if block_b is None:
        block_b = _choose_block_b(B, obs_dim, act_dim, hidden_dim, itemsize)
    assert B % block_b == 0, "block_b must divide B"
    assert block_b % 8 == 0 or block_b == B, "block_b must be 8-aligned"

    grid = (B // block_b,)

    flops = 2 * B * (in_dim * hidden_dim + hidden_dim * obs_dim)
    bytes_accessed = (
        itemsize * (B * in_dim + in_dim * hidden_dim + hidden_dim * obs_dim)
        + jnp.dtype(b1.dtype).itemsize * (hidden_dim + obs_dim)
        + jnp.dtype(params["w2"].dtype).itemsize * B * obs_dim  # output
    )

    return pl.pallas_call(
        world_model_kernel,
        out_shape=jax.ShapeDtypeStruct((B, obs_dim), params["w2"].dtype),
        grid_spec=pltpu.PrefetchScalarGridSpec(
            num_scalar_prefetch=0,
            grid=grid,
            in_specs=[
                pl.BlockSpec((block_b, obs_dim), lambda i: (i, 0)),
                pl.BlockSpec((block_b, act_dim), lambda i: (i, 0)),
                # grid-invariant operands (constant index_map -> DMA'd once)
                pl.BlockSpec((in_dim, hidden_dim), lambda i: (0, 0)),
                pl.BlockSpec((1, hidden_dim), lambda i: (0, 0)),
                pl.BlockSpec((hidden_dim, obs_dim), lambda i: (0, 0)),
                pl.BlockSpec((1, obs_dim), lambda i: (0, 0)),
            ],
            out_specs=pl.BlockSpec((block_b, obs_dim), lambda i: (i, 0)),
        ),
        compiler_params=pltpu.CompilerParams(
            dimension_semantics=("parallel",),
        ),
        cost_estimate=pl.CostEstimate(
            flops=flops, transcendentals=0, bytes_accessed=bytes_accessed),
    )(o, actions, w1, b1, w2, b2)


def init_params(key, obs_dim, act_dim, hidden_dim, dtype=jnp.float32):
    in_dim = obs_dim + act_dim
    k1, k2, k3, k4 = jax.random.split(key, 4)
    # Deterministic small-scale init (uniform, like torch Linear default scale).
    s1 = 1.0 / jnp.sqrt(in_dim)
    s2 = 1.0 / jnp.sqrt(hidden_dim)
    return {
        # Stored kernel-ready: [in, out] weights, 2-D biases -> no per-call
        # slicing / reshaping of parameters in the forward path.
        "w1": jax.random.uniform(k1, (in_dim, hidden_dim), dtype, -s1, s1),
        "b1": jax.random.uniform(k2, (1, hidden_dim), dtype, -s1, s1),
        "w2": jax.random.uniform(k3, (hidden_dim, obs_dim), dtype, -s2, s2),
        "b2": jax.random.uniform(k4, (1, obs_dim), dtype, -s2, s2),
    }


def reference_forward(o, actions, params):
    inps = jnp.concatenate([o, actions], axis=-1)
    h = jnp.maximum(inps @ params["w1"] + params["b1"], 0.0)
    return h @ params["w2"] + params["b2"]


if __name__ == "__main__":
    # Module-consistent small shapes: obs_shape=32, n_agents=2, n_actions=4, hidden_dim=32
    batch = 8
    obs_dim = 32
    n_agents = 2
    n_actions = 4
    act_dim = n_agents * n_actions
    hidden_dim = 32

    key = jax.random.PRNGKey(0)
    ko, ka, kp = jax.random.split(key, 3)
    o = jax.random.normal(ko, (batch, obs_dim), jnp.float32)
    actions = jax.random.normal(ka, (batch, act_dim), jnp.float32)
    params = init_params(kp, obs_dim, act_dim, hidden_dim)

    out = world_model_forward(o, actions, params)
    out = jax.block_until_ready(out)

    ref = reference_forward(o, actions, params)
    assert out.shape == (batch, obs_dim)
    assert jnp.allclose(out, ref, atol=1e-4, rtol=1e-4)

    print("KERNEL_OK")
</pallas_src>

<mosaic_0001>
module attributes {stable_mosaic.version = 11 : i64} {
  func.func @world_model_kernel(%arg0: i32, %arg1: memref<8x32xf32, #tpu.memory_space<vmem>>, %arg2: memref<8x8xf32, #tpu.memory_space<vmem>>, %arg3: memref<40x32xf32, #tpu.memory_space<vmem>>, %arg4: memref<1x32xf32, #tpu.memory_space<vmem>>, %arg5: memref<32x32xf32, #tpu.memory_space<vmem>>, %arg6: memref<1x32xf32, #tpu.memory_space<vmem>>, %arg7: memref<8x32xf32, #tpu.memory_space<vmem>>) attributes {dimension_semantics = [#tpu.dimension_semantics<parallel>], iteration_bounds = array<i64: 1>, scalar_prefetch = 0 : i64, scratch_operands = 0 : i64, tpu.core_type = #tpu.core_type<tc>, window_params = [{transform_indices = @transform_0, window_bounds = array<i64: 8, 32>}, {transform_indices = @transform_1, window_bounds = array<i64: 8, 8>}, {pipeline_mode = #tpu.pipeline_mode<synchronous>, transform_indices = @transform_2, window_bounds = array<i64: 40, 32>}, {pipeline_mode = #tpu.pipeline_mode<synchronous>, transform_indices = @transform_3, window_bounds = array<i64: 1, 32>}, {pipeline_mode = #tpu.pipeline_mode<synchronous>, transform_indices = @transform_4, window_bounds = array<i64: 32, 32>}, {pipeline_mode = #tpu.pipeline_mode<synchronous>, transform_indices = @transform_5, window_bounds = array<i64: 1, 32>}, {transform_indices = @transform_6, window_bounds = array<i64: 8, 32>}]} {
    %c0 = arith.constant 0 : index
    %c0_0 = arith.constant 0 : index
    %0 = vector.load %arg1[%c0, %c0_0] : memref<8x32xf32, #tpu.memory_space<vmem>>, vector<8x32xf32>
    %c0_1 = arith.constant 0 : index
    %c0_2 = arith.constant 0 : index
    %1 = vector.load %arg3[%c0_1, %c0_2] : memref<40x32xf32, #tpu.memory_space<vmem>>, vector<32x32xf32>
    %cst = arith.constant dense<0.000000e+00> : vector<8x32xf32>
    %2 = tpu.matmul %0, %1, %cst {dimension_numbers = #tpu.dot_dimension_numbers<[1], [0], [0], [1], [0, 0, 1, 1], [], []>} : vector<8x32xf32>, vector<32x32xf32>, vector<8x32xf32> -> vector<8x32xf32>
    %c0_3 = arith.constant 0 : index
    %c0_4 = arith.constant 0 : index
    %3 = vector.load %arg2[%c0_3, %c0_4] : memref<8x8xf32, #tpu.memory_space<vmem>>, vector<8x8xf32>
    %c32 = arith.constant 32 : index
    %c0_5 = arith.constant 0 : index
    %4 = vector.load %arg3[%c32, %c0_5] : memref<40x32xf32, #tpu.memory_space<vmem>>, vector<8x32xf32>
    %cst_6 = arith.constant dense<0.000000e+00> : vector<8x32xf32>
    %5 = tpu.matmul %3, %4, %cst_6 {dimension_numbers = #tpu.dot_dimension_numbers<[1], [0], [0], [1], [0, 0, 1, 1], [], []>} : vector<8x8xf32>, vector<8x32xf32>, vector<8x32xf32> -> vector<8x32xf32>
    %6 = arith.addf %2, %5 : vector<8x32xf32>
    %c0_7 = arith.constant 0 : index
    %c0_8 = arith.constant 0 : index
    %7 = vector.load %arg4[%c0_7, %c0_8] : memref<1x32xf32, #tpu.memory_space<vmem>>, vector<1x32xf32>
    %8 = vector.broadcast %7 : vector<1x32xf32> to vector<8x32xf32>
    %9 = arith.addf %6, %8 : vector<8x32xf32>
    %cst_9 = arith.constant 0.000000e+00 : f32
    %10 = vector.broadcast %cst_9 : f32 to vector<8x32xf32>
    %11 = arith.maximumf %9, %10 : vector<8x32xf32>
    %c0_10 = arith.constant 0 : index
    %c0_11 = arith.constant 0 : index
    %12 = vector.load %arg5[%c0_10, %c0_11] : memref<32x32xf32, #tpu.memory_space<vmem>>, vector<32x32xf32>
    %cst_12 = arith.constant dense<0.000000e+00> : vector<8x32xf32>
    %13 = tpu.matmul %11, %12, %cst_12 {dimension_numbers = #tpu.dot_dimension_numbers<[1], [0], [0], [1], [0, 0, 1, 1], [], []>} : vector<8x32xf32>, vector<32x32xf32>, vector<8x32xf32> -> vector<8x32xf32>
    %c0_13 = arith.constant 0 : index
    %c0_14 = arith.constant 0 : index
    %14 = vector.load %arg6[%c0_13, %c0_14] : memref<1x32xf32, #tpu.memory_space<vmem>>, vector<1x32xf32>
    %15 = vector.broadcast %14 : vector<1x32xf32> to vector<8x32xf32>
    %16 = arith.addf %13, %15 : vector<8x32xf32>
    %c0_15 = arith.constant 0 : index
    %c0_16 = arith.constant 0 : index
    %17 = vector.load %arg7[%c0_15, %c0_16] : memref<8x32xf32, #tpu.memory_space<vmem>>, vector<8x32xf32>
    tpu.vector_store %arg7[%c0_15, %c0_16], %16 {strides = array<i32>} : memref<8x32xf32, #tpu.memory_space<vmem>>, vector<8x32xf32>,
    return
  }
  func.func @transform_0(%arg0: i32) -> (i32, i32) {
    %c0_i32 = arith.constant 0 : i32
    %c0_i32_0 = arith.constant 0 : i32
    return %arg0, %c0_i32 : i32, i32
  }
  func.func @transform_1(%arg0: i32) -> (i32, i32) {
    %c0_i32 = arith.constant 0 : i32
    %c0_i32_0 = arith.constant 0 : i32
    return %arg0, %c0_i32 : i32, i32
  }
  func.func @transform_2(%arg0: i32) -> (i32, i32) {
    %c0_i32 = arith.constant 0 : i32
    %c0_i32_0 = arith.constant 0 : i32
    %c0_i32_1 = arith.constant 0 : i32
    return %c0_i32, %c0_i32_0 : i32, i32
  }
  func.func @transform_3(%arg0: i32) -> (i32, i32) {
    %c0_i32 = arith.constant 0 : i32
    %c0_i32_0 = arith.constant 0 : i32
    %c0_i32_1 = arith.constant 0 : i32
    return %c0_i32, %c0_i32_0 : i32, i32
  }
  func.func @transform_4(%arg0: i32) -> (i32, i32) {
    %c0_i32 = arith.constant 0 : i32
    %c0_i32_0 = arith.constant 0 : i32
    %c0_i32_1 = arith.constant 0 : i32
    return %c0_i32, %c0_i32_0 : i32, i32
  }
  func.func @transform_5(%arg0: i32) -> (i32, i32) {
    %c0_i32 = arith.constant 0 : i32
    %c0_i32_0 = arith.constant 0 : i32
    %c0_i32_1 = arith.constant 0 : i32
    return %c0_i32, %c0_i32_0 : i32, i32
  }
  func.func @transform_6(%arg0: i32) -> (i32, i32) {
    %c0_i32 = arith.constant 0 : i32
    %c0_i32_0 = arith.constant 0 : i32
    return %arg0, %c0_i32 : i32, i32
  }
}

</mosaic_0001>

<bundles_post_ra>
// kernel: tpu_custom_call.1
= control target key start
LH: loop header
LB: loop body
LE: loop exit
PB: predicated region body
PF: predicated region fallthrough
CT: control target
= control target key end

     0   :  { %v371_v3 = vmov 0.0|0.0   ;;  %v372_v5 = vmov 0.0   ;;  %vm31_vm0 = vcmask 64512   ;;  %vm373_vm1 = vmmov 0   ;;  %s464_s0 = inlined_call_operand.vmem [shape: f32[8,32], index: 0, kind: input, shape index: {}]   ;;  %s465_s1 = inlined_call_operand.vmem [shape: f32[8,8], index: 1, kind: input, shape index: {}]   ;;  %s466_s2 = inlined_call_operand.vmem [shape: f32[40,32], index: 2, kind: input, shape index: {}]   ;;  %s467_s3 = inlined_call_operand.vmem [shape: f32[1,32], index: 3, kind: input, shape index: {}]   ;;  %s468_s4 = inlined_call_operand.vmem [shape: f32[32,32], index: 4, kind: input, shape index: {}]   ;;  %s469_s5 = inlined_call_operand.vmem [shape: f32[1,32], index: 5, kind: input, shape index: {}]   ;;  %s470_s6 = inlined_call_operand.hbm [shape: f32[8,32], index: 6, kind: output, shape index: {}]  }
   0x1   :  { %v25_v0 = vld [vmem:[%s466_s2] sm:$0xff]  ;;  %v26_v1 = vld [vmem:[%s466_s2 + $0x8] sm:$0xff]  ;;  %v27_v2 = vld [vmem:[%s466_s2 + $0x10] sm:$0xff]  ;;  %331 = vmatprep.subr.bf16.mxu1 %v371_v3  ;;  %304 = vmatprep.subr.mxu0 %v372_v5 }
   0x2   :  { %v332_v4 = vpack.c.bf16 %v26_v1, %v25_v0  ;;  %v28_v6 = vld [vmem:[%s466_s2 + $0x18] sm:$0xff]  ;;  %v30_v7 = vld [vmem:[%s466_s2 + $0x20] sm:$0xff]  ;;  %306 = vmatprep.mubr.msk.f32.mxu0 %vm373_vm1, %v372_v5 }
   0x3   :  { %v29_v8 = vld [vmem:[%s465_s1] sm:$0xff]  ;;  %305 = vmatpush3.msra.mxu0 %v30_v7 }
   0x4   :  { %11 = vsyncpa [#allocation3], 0  ;;  %333 = vmatpush3.bf16.msra.mxu1 %v332_v4  ;;  %v335_v9 = vpack.c.bf16 %v28_v6, %v27_v2  ;;  %307 = vmatmul.mubr.msk.f32.vlgmr.msra.gmra.mrb[0].mxu0 %vm31_vm0, %v29_v8  ;;  %v24_v10 = vld [vmem:[%s464_s0] sm:$0xff]  ;;  %vm105_vm2 = vcmask 261120   ;;  %v189_v12 = vld [vmem:[%s468_s4 + $0x8] sm:$0xff] }
   0x5   :  { %334 = vmatprep.subr.bf16.mxu1 %v371_v3  ;;  %317 = vmatprep.mubr.msk.f32.mxu1 %vm373_vm1, %v372_v5  ;;  %v188_v11 = vld [vmem:[%s468_s4] sm:$0xff]  ;;  %v190_v14 = vld [vmem:[%s468_s4 + $0x10] sm:$0xff]  ;;  %v191_v15 = vld [vmem:[%s468_s4 + $0x18] sm:$0xff]  ;;  %s374_s4 = smov [#allocation2]  }
   0x6   :  { %337 = vmatprep.subr.bf16.mxu0 %v371_v3  ;;  %328 = vmatprep.mubr.msk.f32.mxu0 %vm373_vm1, %v372_v5  ;;  %v338_v13 = vpack.c.bf16 %v189_v12, %v188_v11  ;;  %v341_v16 = vpack.c.bf16 %v191_v15, %v190_v14  ;;  %v289_v20 = vld [vmem:[%s467_s3] ss:$0 sm:$0xff]  ;;  %s279_s20 = sshll.u32 %s374_s4, 4  ;;  %s280_s20 = int_to_ptr.vmem [resolvable:$true] %s279_s20 }
   0x7   :  { %v290_v25 = vld [vmem:[%s469_s5] ss:$0 sm:$0xff]  ;;  %s347_s21 = scalar_lea.vmem %s280_s20, 128  ;;  %p352_p1 = scmp.lt.s32.totalorder %s280_s20, %s280_s20 }
   0x8   :  { %336 = vmatpush3.bf16.msra.mxu1 %v335_v9  ;;  %339 = vmatpush3.bf16.msra.mxu0 %v338_v13  ;;  %p348_p0 = scmp.ne.s32.totalorder %s280_s20, %s347_s21  ;;  %p353_p2 = scmp.lt.s32.totalorder %s347_s21, %s347_s21 }
   0x9   :  { %340 = vmatprep.subr.bf16.mxu0 %v371_v3 }
   0xa   :  { %p354_p3 = por %p353_p2, %p352_p1 }
   0xb   :  { %318 = vmatmul.mubr.msk.f32.vlgmr.msra.gmra.mrb[0].mxu1 %vm105_vm2, %v24_v10 }
   0xc   :  { %342 = vmatpush3.bf16.msra.mxu0 %v341_v16  ;;  %p355_p4 = pnand %p354_p3, %p348_p0 }
  0xd7   :  { %v101_v17 = vpop.f32.mrb[0].mxu0 }
  0xd8   :  { %v308_v18 = vpop.f32.mrb[1].mxu0 }
  0xde   :  { %v175_v19 = vpop.f32.mrb[0].mxu1 }
  0xdf   :  { %v176_v21 = vadd.f32 %v175_v19, %v101_v17  ;;  %v319_v22 = vpop.f32.mrb[1].mxu1 }
  0xe1   :  { %v186_v23 = vadd.f32 %v289_v20, %v176_v21 }
  0xe3   :  { %v187_v24 = vmax.f32 %v186_v23, 0.0 }
  0xe5   :  { %329 = vmatmul.mubr.msk.f32.vlgmr.msra.gmra.mrb[2].mxu0 %vm105_vm2, %v187_v24 }
 0x1b8   :  { %v268_v26 = vpop.f32.mrb[2].mxu0 }
 0x1b9   :  { %v269_v27 = vadd.f32 %v290_v25, %v268_v26  ;;  %v330_v28 = vpop.f32.mrb[3].mxu0 }
 0x1bb   :  { %272 = vst.msk [vmem:[#allocation2] sm:$0xff] %vm105_vm2, %v269_v27 }
 0x1bc   :  { %358 = shalt.err (!%p355_p4)
}
 0x1bd   :  { %s359_s23 = scalar_lea.hbm %s470_s6, 128 }
 0x1be   :  { %p360_p5 = scmp.ne.s32.totalorder %s470_s6, %s359_s23  ;;  %p363_p6 = scmp.lt.u32.totalorder %s359_s23, %s470_s6 }
 0x1c0   :  { %p365_p7 = pnand %p363_p6, %p360_p5 }
 0x1c2   :  { %368 = shalt.err (!%p365_p7)
}
 0x1c3   :  { %282 = dma.vmem_to_hbm [thread:$0]  %s280_s20, 128, %s470_s6, [#allocation3]  }
 0x1c4   :  { %369 = dma.done.wait [#allocation3], 128  }
 0x1c5   :  { %370 = vsyncadd [#allocation3], 4294967168 }
 0x1c6   :  { %286 = vsyncpa [#allocation3], 1 }

</bundles_post_ra>
